<compile_context>
chip_gen: v7x
topology: tpu7x:2x2x1
jax: 0.10.0
libtpu: 0.0.40
codegen_flags: <defaults>
</compile_context>

<pallas_src>
import functools

import jax
import jax.numpy as jnp
from jax.experimental import pallas as pl
from jax.experimental.pallas import tpu as pltpu


def _wdist_kernel(real_ref, fake_ref, out_ref, *, rows, tr, bps, chunk, need_mask):
    """One grid step: out_ref (8,128) f32 += folded sum(real - fake) of this block."""
    c = pl.program_id(0)          # split axis ("parallel": shards across cores)
    j = pl.program_id(1)          # streaming axis ("arbitrary": resident output)

    @pl.when(j == 0)
    def _():
        out_ref[...] = jnp.zeros_like(out_ref)

    b = c * bps + j               # logical flat block index
    base = b * tr                 # logical first row of this block

    def _accumulate(mask_rows):
        acc = jnp.zeros((8, 128), jnp.float32)
        for lo in range(0, tr, chunk):
            nr = min(chunk, tr - lo)          # static, multiple of 8
            # Fused reduction: sum(real) - sum(fake) == sum(real - fake).
            d = (real_ref[pl.ds(lo, nr), :].astype(jnp.float32)
                 - fake_ref[pl.ds(lo, nr), :].astype(jnp.float32))
            if mask_rows:
                row = (jax.lax.broadcasted_iota(jnp.int32, (nr, 128), 0)
                       + (base + lo))
                d = jnp.where(row < rows, d, jnp.float32(0.0))
            # Fold onto one (8,128) vreg: vreg-tile-aligned reshape, VPU-only.
            acc = acc + d.reshape(nr // 8, 8, 128).sum(axis=0)
        out_ref[...] += acc

    if need_mask:
        # Only blocks that extend past the valid rows (ragged last block and
        # any clamped duplicate blocks) take the masked path.
        @pl.when(base + tr > rows)
        def _():
            _accumulate(True)

        @pl.when(base + tr <= rows)
        def _():
            _accumulate(False)
    else:
        _accumulate(False)


def _num_tensorcores():
    # Best-effort detection: 2 on multi-TensorCore chips (v7x), 1 elsewhere.
    try:
        return max(1, int(getattr(jax.devices()[0], "num_cores", 1)))
    except Exception:
        return 1


def wasserstein_distance(real, fake, *, max_block_rows=None, num_splits=None):
    """Returns a scalar float32: (real.sum() - fake.sum()) / fake.shape[0]."""
    batch = int(fake.shape[0])
    inv_b = jnp.float32(1.0 / float(batch))

    real_flat = real.reshape(-1)
    fake_flat = fake.reshape(-1)
    n_real = int(real_flat.shape[0])
    n_fake = int(fake_flat.shape[0])

    # Largest 128-multiple prefix common to both inputs -> zero-copy lane-dense
    # slabs.  For the WGAN case (equal shapes, 128-multiple) this is everything.
    rows = min(n_real // 128, n_fake // 128)

    itemsizes = (jnp.dtype(real.dtype).itemsize, jnp.dtype(fake.dtype).itemsize)
    sub_mult = max(8, 32 // min(itemsizes))   # 8 f32 / 16 bf16 / 32 int8

    if rows < sub_mult:
        # Tiny input: a kernel launch isn't worth it; plain JAX is exact.
        total = (jnp.sum(real_flat.astype(jnp.float32))
                 - jnp.sum(fake_flat.astype(jnp.float32)))
        return (total * inv_b).astype(jnp.float32)

    # ~4 MiB of HBM bytes per input per grid step regardless of dtype
    # (amortizes the ~0.35us per-step overhead); 2 inputs x 2 pipeline buffers
    # stay ~16 MiB of VMEM, which fits v5e/v6e/v7x with the 32 MiB limit below.
    if max_block_rows is None:
        max_block_rows = 8192 * max(1, 4 // max(itemsizes))
    tr = min(max_block_rows, rows)
    tr -= tr % sub_mult                       # multiple of the sublane tile
    chunk = min(2048, tr)                     # keeps f32 intermediates ~1 MiB

    nblocks = -(-rows // tr)
    if num_splits is None:
        num_splits = _num_tensorcores()
    nsplits = max(1, min(int(num_splits), nblocks))
    bps = -(-nblocks // nsplits)              # blocks per split
    need_mask = (nsplits * bps * tr) != rows

    prefix = rows * 128
    real2d = real_flat[:prefix].reshape(rows, 128)
    fake2d = fake_flat[:prefix].reshape(rows, 128)

    if nsplits * bps == nblocks:
        in_map = lambda c, j: (c * bps + j, 0)
    else:
        last_blk = nblocks - 1                # clamp duplicate blocks in-bounds
        in_map = lambda c, j: (jnp.minimum(c * bps + j, last_blk), 0)

    kernel = functools.partial(
        _wdist_kernel, rows=rows, tr=tr, bps=bps, chunk=chunk, need_mask=need_mask)

    partials = pl.pallas_call(
        kernel,
        out_shape=jax.ShapeDtypeStruct((nsplits * 8, 128), jnp.float32),
        grid_spec=pltpu.PrefetchScalarGridSpec(
            num_scalar_prefetch=0,
            grid=(nsplits, bps),
            in_specs=[
                pl.BlockSpec((tr, 128), in_map),
                pl.BlockSpec((tr, 128), in_map),
            ],
            out_specs=pl.BlockSpec((8, 128), lambda c, j: (c, 0)),
        ),
        compiler_params=pltpu.CompilerParams(
            dimension_semantics=("parallel", "arbitrary"),
            vmem_limit_bytes=32 * 1024 * 1024,
        ),
        cost_estimate=pl.CostEstimate(
            flops=2 * rows * 128,
            transcendentals=0,
            bytes_accessed=int(real2d.size) * int(itemsizes[0])
                           + int(fake2d.size) * int(itemsizes[1]),
        ),
    )(real2d, fake2d)

    total = jnp.sum(partials)

    # Sub-128-element tails (and any size mismatch past the common prefix):
    # summed directly, no full-array pad/copy.
    if prefix < n_real:
        total = total + jnp.sum(real_flat[prefix:].astype(jnp.float32))
    if prefix < n_fake:
        total = total - jnp.sum(fake_flat[prefix:].astype(jnp.float32))

    return (total * inv_b).astype(jnp.float32)


if __name__ == "__main__":
    key = jax.random.PRNGKey(0)
    k_real, k_fake = jax.random.split(key)

    # NCHW, consistent with a small WGAN critic batch.
    real = jax.random.normal(k_real, (2, 4, 16, 16), dtype=jnp.float32)
    fake = jax.random.normal(k_fake, (2, 4, 16, 16), dtype=jnp.float32)

    result = jax.block_until_ready(wasserstein_distance(real, fake))

    expected = (jnp.sum(real) - jnp.sum(fake)) / fake.shape[0]
    assert jnp.allclose(result, expected, rtol=1e-5, atol=1e-5), (result, expected)

    print("KERNEL_OK")
</pallas_src>

<mosaic_0001>
module attributes {stable_mosaic.version = 11 : i64} {
  func.func @_wdist_kernel(%arg0: i32, %arg1: i32, %arg2: memref<16x128xf32, #tpu.memory_space<vmem>>, %arg3: memref<16x128xf32, #tpu.memory_space<vmem>>, %arg4: memref<8x128xf32, #tpu.memory_space<vmem>>) attributes {dimension_semantics = [#tpu.dimension_semantics<parallel>, #tpu.dimension_semantics<arbitrary>], iteration_bounds = array<i64: 1, 1>, scalar_prefetch = 0 : i64, scratch_operands = 0 : i64, tpu.core_type = #tpu.core_type<tc>, window_params = [{transform_indices = @transform_0, window_bounds = array<i64: 16, 128>}, {transform_indices = @transform_1, window_bounds = array<i64: 16, 128>}, {transform_indices = @transform_2, window_bounds = array<i64: 8, 128>}]} {
    %c0_i32 = arith.constant 0 : i32
    %0 = arith.cmpi eq, %arg1, %c0_i32 : i32
    %1 = arith.extui %0 : i1 to i32
    %c0_i32_0 = arith.constant 0 : i32
    %2 = arith.cmpi ne, %1, %c0_i32_0 : i32
    scf.if %2 {
      %cst_9 = arith.constant 0.000000e+00 : f32
      %13 = vector.broadcast %cst_9 : f32 to vector<8x128xf32>
      %c0_10 = arith.constant 0 : index
      %c0_11 = arith.constant 0 : index
      %14 = vector.load %arg4[%c0_10, %c0_11] : memref<8x128xf32, #tpu.memory_space<vmem>>, vector<8x128xf32>
      tpu.vector_store %arg4[%c0_10, %c0_11], %13 {strides = array<i32>} : memref<8x128xf32, #tpu.memory_space<vmem>>, vector<8x128xf32>,
    } else {
    }
    %cst = arith.constant 0.000000e+00 : f32
    %3 = vector.broadcast %cst : f32 to vector<8x128xf32>
    %c0 = arith.constant 0 : index
    %c0_1 = arith.constant 0 : index
    %4 = vector.load %arg2[%c0, %c0_1] : memref<16x128xf32, #tpu.memory_space<vmem>>, vector<16x128xf32>
    %c0_2 = arith.constant 0 : index
    %c0_3 = arith.constant 0 : index
    %5 = vector.load %arg3[%c0_2, %c0_3] : memref<16x128xf32, #tpu.memory_space<vmem>>, vector<16x128xf32>
    %6 = arith.subf %4, %5 : vector<16x128xf32>
    %7 = vector.shape_cast %6 : vector<16x128xf32> to vector<2x8x128xf32>
    %cst_4 = arith.constant dense<0.000000e+00> : vector<8x128xf32>
    %8 = vector.multi_reduction <add>, %7, %cst_4 [0] : vector<2x8x128xf32> to vector<8x128xf32>
    %9 = arith.addf %3, %8 : vector<8x128xf32>
    %c0_5 = arith.constant 0 : index
    %c0_6 = arith.constant 0 : index
    %10 = vector.load %arg4[%c0_5, %c0_6] : memref<8x128xf32, #tpu.memory_space<vmem>>, vector<8x128xf32>
    %11 = arith.addf %10, %9 : vector<8x128xf32>
    %c0_7 = arith.constant 0 : index
    %c0_8 = arith.constant 0 : index
    %12 = vector.load %arg4[%c0_7, %c0_8] : memref<8x128xf32, #tpu.memory_space<vmem>>, vector<8x128xf32>
    tpu.vector_store %arg4[%c0_7, %c0_8], %11 {strides = array<i32>} : memref<8x128xf32, #tpu.memory_space<vmem>>, vector<8x128xf32>,
    return
  }
  func.func @transform_0(%arg0: i32, %arg1: i32) -> (i32, i32) {
    %c1_i32 = arith.constant 1 : i32
    %0 = arith.muli %arg0, %c1_i32 : i32
    %1 = arith.addi %0, %arg1 : i32
    %c0_i32 = arith.constant 0 : i32
    %c0_i32_0 = arith.constant 0 : i32
    return %1, %c0_i32 : i32, i32
  }
  func.func @transform_1(%arg0: i32, %arg1: i32) -> (i32, i32) {
    %c1_i32 = arith.constant 1 : i32
    %0 = arith.muli %arg0, %c1_i32 : i32
    %1 = arith.addi %0, %arg1 : i32
    %c0_i32 = arith.constant 0 : i32
    %c0_i32_0 = arith.constant 0 : i32
    return %1, %c0_i32 : i32, i32
  }
  func.func @transform_2(%arg0: i32, %arg1: i32) -> (i32, i32) {
    %c0_i32 = arith.constant 0 : i32
    %c0_i32_0 = arith.constant 0 : i32
    return %arg0, %c0_i32 : i32, i32
  }
}

</mosaic_0001>

<bundles_post_ra>
// kernel: tpu_custom_call.1
= control target key start
LH: loop header
LB: loop body
LE: loop exit
PB: predicated region body
PF: predicated region fallthrough
CT: control target
= control target key end

     0   :  { %7 = vsyncpa [#allocation3], 0  ;;  %s218_s0 = inlined_call_operand.hbm [shape: f32[16,128], index: 0, kind: input, shape index: {}]   ;;  %s219_s1 = inlined_call_operand.hbm [shape: f32[16,128], index: 1, kind: input, shape index: {}]   ;;  %s220_s2 = inlined_call_operand.hbm [shape: f32[8,128], index: 2, kind: output, shape index: {}]  }
   0x1   :  { %8 = vsyncpa [#allocation6], 0 }
   0x2   :  { %9 = vsyncpa [#allocation4], 0  ;;  %s162_s9 = smov [#allocation2]   ;;  %s90_s13 = scalar_lea.hbm %s218_s0, 256 }
   0x3   :  { %s19_s10 = sshll.u32 %s162_s9, 4  ;;  %p91_p0 = scmp.ne.s32.totalorder %s218_s0, %s90_s13  ;;  %s20_s10 = int_to_ptr.vmem [resolvable:$true] %s19_s10 }
   0x4   :  { %p94_p1 = scmp.lt.u32.totalorder %s90_s13, %s218_s0 }
   0x6   :  { %p96_p2 = pnand %p94_p1, %p91_p0 }
   0x8   :  { %99 = shalt.err (!%p96_p2)
}
   0x9   :  { %s100_s18 = scalar_lea.vmem %s20_s10, 256  ;;  %p105_p4 = scmp.lt.s32.totalorder %s20_s10, %s20_s10 }
   0xa   :  { %p101_p3 = scmp.ne.s32.totalorder %s20_s10, %s100_s18  ;;  %p106_p5 = scmp.lt.s32.totalorder %s100_s18, %s100_s18 }
   0xc   :  { %p107_p6 = por %p106_p5, %p105_p4 }
   0xe   :  { %p108_p7 = pnand %p107_p6, %p101_p3 }
  0x10   :  { %111 = shalt.err (!%p108_p7)
}
  0x11   :  { %s163_s19 = smov 128   ;;  %s164_s20 = smov 8  }
  0x12   :  { %25 = dma.hbm_to_vmem [thread:$0]  %s218_s0, 256, %s20_s10, [#allocation3], %s163_s19, %s163_s19, %s164_s20  }
  0x13   :  { %s165_s23 = smov [#allocation5]   ;;  %s112_s27 = scalar_lea.hbm %s219_s1, 256 }
  0x14   :  { %s35_s24 = sshll.u32 %s165_s23, 4  ;;  %p113_p8 = scmp.ne.s32.totalorder %s219_s1, %s112_s27  ;;  %s36_s24 = int_to_ptr.vmem [resolvable:$true] %s35_s24 }
  0x15   :  { %p116_p9 = scmp.lt.u32.totalorder %s112_s27, %s219_s1 }
  0x17   :  { %p118_p10 = pnand %p116_p9, %p113_p8 }
  0x19   :  { %121 = shalt.err (!%p118_p10)
}
  0x1a   :  { %s122_s4 = scalar_lea.vmem %s36_s24, 256  ;;  %p127_p12 = scmp.lt.s32.totalorder %s36_s24, %s36_s24 }
  0x1b   :  { %p123_p11 = scmp.ne.s32.totalorder %s36_s24, %s122_s4  ;;  %p128_p13 = scmp.lt.s32.totalorder %s122_s4, %s122_s4 }
  0x1d   :  { %p129_p0 = por %p128_p13, %p127_p12 }
  0x1f   :  { %p130_p1 = pnand %p129_p0, %p123_p11 }
  0x21   :  { %133 = shalt.err (!%p130_p1)
}
  0x22   :  { %41 = dma.hbm_to_vmem [thread:$0]  %s219_s1, 256, %s36_s24, [#allocation6], %s163_s19, %s163_s19, %s164_s20  }
  0x23   :  { %156 = dma.done.wait [#allocation3], 256  }
  0x24   :  { %157 = vsyncadd [#allocation3], 4294967040 }
  0x25   :  { %158 = dma.done.wait [#allocation6], 256  }
  0x26   :  { %159 = vsyncadd [#allocation6], 4294967040  ;;  %v57_v0 = vld [vmem:[#allocation2] sm:$0xff]  ;;  %v58_v1 = vld [vmem:[#allocation2 + $0x8] sm:$0xff]  ;;  %s166_s6 = smov [#allocation7]  }
  0x27   :  { %v59_v2 = vld [vmem:[#allocation5] sm:$0xff]  ;;  %v60_v3 = vld [vmem:[#allocation5 + $0x8] sm:$0xff]  ;;  %s74_s7 = sshll.u32 %s166_s6, 4  ;;  %s75_s7 = int_to_ptr.vmem [resolvable:$true] %s74_s7 }
  0x28   :  { %v61_v4 = vsub.f32 %v57_v0, %v59_v2  ;;  %v62_v5 = vsub.f32 %v58_v1, %v60_v3  ;;  %s134_s8 = scalar_lea.vmem %s75_s7, 128  ;;  %p139_p3 = scmp.lt.s32.totalorder %s75_s7, %s75_s7 }
  0x29   :  { %p135_p2 = scmp.ne.s32.totalorder %s75_s7, %s134_s8  ;;  %p140_p4 = scmp.lt.s32.totalorder %s134_s8, %s134_s8 }
  0x2a   :  { %v63_v6 = vadd.f32 %v62_v5, %v61_v4 }
  0x2b   :  { %p141_p5 = por %p140_p4, %p139_p3 }
  0x2c   :  { %67 = vst [vmem:[#allocation7] sm:$0xff] %v63_v6 }
  0x2d   :  { %p142_p6 = pnand %p141_p5, %p135_p2 }
  0x2f   :  { %145 = shalt.err (!%p142_p6)
}
  0x30   :  { %s146_s10 = scalar_lea.hbm %s220_s2, 128 }
  0x31   :  { %p147_p7 = scmp.ne.s32.totalorder %s220_s2, %s146_s10  ;;  %p150_p8 = scmp.lt.u32.totalorder %s146_s10, %s220_s2 }
  0x33   :  { %p152_p9 = pnand %p150_p8, %p147_p7 }
  0x35   :  { %155 = shalt.err (!%p152_p9)
}
  0x36   :  { %77 = dma.vmem_to_hbm [thread:$0]  %s75_s7, 128, %s220_s2, [#allocation4]  }
  0x37   :  { %160 = dma.done.wait [#allocation4], 128  }
  0x38   :  { %161 = vsyncadd [#allocation4], 4294967168 }
  0x39   :  { %81 = vsyncpa [#allocation3], 1 }
  0x3a   :  { %82 = vsyncpa [#allocation6], 1 }
  0x3b   :  { %83 = vsyncpa [#allocation4], 1 }

</bundles_post_ra>
